<compile_context>
chip_gen: v6e
topology: v6e:2x2x1
jax: 0.10.0
libtpu: 0.0.40
codegen_flags: <defaults>
</compile_context>

<pallas_src>
import jax
import jax.numpy as jnp
from jax.experimental import pallas as pl
from jax.experimental.pallas import tpu as pltpu


def _relu_conv1x1_kernel(x_ref, w_ref, b_ref, o_ref):
    # x_ref: (M, Cin) f32   w_ref: (Cin, Cout) f32|bf16
    # b_ref: (1, Cout) f32  o_ref: (M, Cout) f32
    x = jnp.maximum(x_ref[...], 0.0)            # ReLU on the VPU, in f32
    x = x.astype(w_ref.dtype)                   # cast only the MXU operand (no-op for f32)
    acc = jnp.dot(x, w_ref[...],                # 1x1 conv == matmul (MXU), f32 accumulation
                  preferred_element_type=jnp.float32)
    o_ref[...] = acc + b_ref[...]               # bias broadcast over rows (VPU, f32)


def prepare_conv1x1_params(weight, bias, weight_dtype=jnp.float32):
    """One-time parameter prep (hoisted out of the per-call path).

    (Cout, Cin, 1, 1) conv weight -> (Cin, Cout) matmul weight in `weight_dtype`,
    bias (Cout,) -> (1, Cout) f32. No Cout padding: the kernel writes the true
    320-wide output and the wrapper does no post-call slicing.
    """
    Cout, Cin = int(weight.shape[0]), int(weight.shape[1])
    w_t = jnp.asarray(weight, jnp.float32).reshape(Cout, Cin).T.astype(weight_dtype)
    b_row = jnp.asarray(bias, jnp.float32).reshape(1, Cout)
    return w_t, b_row


def make_relu_conv1x1(weight, bias, weight_dtype=jnp.float32):
    """Returns a jitted forward fn closing over the pre-transposed params.

    weight_dtype=jnp.bfloat16 halves the weight DMA and uses a single MXU pass
    (recommended for v5e deployments); numerics are then no longer bit-exact
    vs the f32 PyTorch reference.
    """
    w_t, b_row = prepare_conv1x1_params(weight, bias, weight_dtype)
    cin, cout = int(w_t.shape[0]), int(w_t.shape[1])
    w_bytes = jnp.dtype(weight_dtype).itemsize

    @jax.jit
    def fwd(x_nchw):
        N, Cin, H, W = x_nchw.shape
        # This module has H = W = 1, so NCHW <-> row-matrix is a pure reshape.
        assert Cin == cin and H == 1 and W == 1
        m = N * H * W
        x_rows = x_nchw.reshape(m, Cin)

        out_rows = pl.pallas_call(
            _relu_conv1x1_kernel,
            out_shape=jax.ShapeDtypeStruct((m, cout), jnp.float32),
            in_specs=[
                pl.BlockSpec((m, cin), lambda: (0, 0),
                             memory_space=pltpu.MemorySpace.VMEM),
                pl.BlockSpec((cin, cout), lambda: (0, 0),
                             memory_space=pltpu.MemorySpace.VMEM),
                pl.BlockSpec((1, cout), lambda: (0, 0),
                             memory_space=pltpu.MemorySpace.VMEM),
            ],
            out_specs=pl.BlockSpec((m, cout), lambda: (0, 0),
                                   memory_space=pltpu.MemorySpace.VMEM),
            cost_estimate=pl.CostEstimate(
                flops=2 * m * cin * cout,
                transcendentals=0,
                bytes_accessed=(4 * m * cin            # x (f32)
                                + w_bytes * cin * cout  # weight
                                + 4 * cout              # bias (f32)
                                + 4 * m * cout)),       # output (f32)
        )(x_rows, w_t, b_row)

        # 1x1 spatial -> pure reshape back to NCHW; no slicing needed.
        return out_rows.reshape(N, cout, 1, 1)

    return fwd


if __name__ == "__main__":
    key = jax.random.PRNGKey(0)
    k_x, k_w, k_b = jax.random.split(key, 3)

    N, Cin, H, W, Cout = 1, 36, 1, 1, 320

    # Deterministic synthetic input + parameters (PyTorch-style uniform init bound).
    x = jax.random.normal(k_x, (N, Cin, H, W), dtype=jnp.float32)
    bound = float(1.0 / (Cin ** 0.5))  # fan_in = Cin * 1 * 1
    weight = jax.random.uniform(k_w, (Cout, Cin, 1, 1), dtype=jnp.float32,
                                minval=-bound, maxval=bound)
    bias = jax.random.uniform(k_b, (Cout,), dtype=jnp.float32,
                              minval=-bound, maxval=bound)

    fwd = make_relu_conv1x1(weight, bias)          # f32 weights: matches PyTorch math
    out = jax.block_until_ready(fwd(x))
    assert out.shape == (N, Cout, H, W), out.shape

    # Pure-JAX reference check (same math path as the PyTorch forward).
    x_relu = jnp.maximum(x, 0.0)
    ref = jnp.einsum("nchw,oc->nohw", x_relu, weight.reshape(Cout, Cin)) \
        + bias.reshape(1, Cout, 1, 1)
    assert jnp.allclose(out, ref, atol=1e-5, rtol=1e-5)

    print("KERNEL_OK")
</pallas_src>

<mosaic_0001>
module attributes {stable_mosaic.version = 11 : i64} {
  func.func @_relu_conv1x1_kernel(%arg0: memref<1x36xf32, #tpu.memory_space<vmem>>, %arg1: memref<36x320xf32, #tpu.memory_space<vmem>>, %arg2: memref<1x320xf32, #tpu.memory_space<vmem>>, %arg3: memref<1x320xf32, #tpu.memory_space<vmem>>) attributes {dimension_semantics = [], scalar_prefetch = 0 : i64, scratch_operands = 0 : i64, tpu.core_type = #tpu.core_type<tc>} {
    %c0 = arith.constant 0 : index
    %c0_0 = arith.constant 0 : index
    %0 = vector.load %arg0[%c0, %c0_0] : memref<1x36xf32, #tpu.memory_space<vmem>>, vector<1x36xf32>
    %cst = arith.constant 0.000000e+00 : f32
    %1 = vector.broadcast %cst : f32 to vector<1x36xf32>
    %2 = arith.maximumf %0, %1 : vector<1x36xf32>
    %c0_1 = arith.constant 0 : index
    %c0_2 = arith.constant 0 : index
    %3 = vector.load %arg1[%c0_1, %c0_2] : memref<36x320xf32, #tpu.memory_space<vmem>>, vector<36x320xf32>
    %cst_3 = arith.constant dense<0.000000e+00> : vector<1x320xf32>
    %4 = tpu.matmul %2, %3, %cst_3 {dimension_numbers = #tpu.dot_dimension_numbers<[1], [0], [0], [1], [0, 0, 1, 1], [], []>} : vector<1x36xf32>, vector<36x320xf32>, vector<1x320xf32> -> vector<1x320xf32>
    %c0_4 = arith.constant 0 : index
    %c0_5 = arith.constant 0 : index
    %5 = vector.load %arg2[%c0_4, %c0_5] : memref<1x320xf32, #tpu.memory_space<vmem>>, vector<1x320xf32>
    %6 = arith.addf %4, %5 : vector<1x320xf32>
    %c0_6 = arith.constant 0 : index
    %c0_7 = arith.constant 0 : index
    %7 = vector.load %arg3[%c0_6, %c0_7] : memref<1x320xf32, #tpu.memory_space<vmem>>, vector<1x320xf32>
    tpu.vector_store %arg3[%c0_6, %c0_7], %6 {strides = array<i32>} : memref<1x320xf32, #tpu.memory_space<vmem>>, vector<1x320xf32>,
    return
  }
}

</mosaic_0001>

<bundles_post_ra>
// kernel: fwd.1
= control target key start
LH: loop header
LB: loop body
LE: loop exit
PB: predicated region body
PF: predicated region fallthrough
CT: control target
= control target key end

     0   :  { %8 = vsyncpa [#allocation3], 0  ;;  %s379_s0 = inlined_call_operand.vmem [shape: f32[1,36], index: 0, kind: input, shape index: {}]   ;;  %s380_s1 = inlined_call_operand.hbm [shape: f32[36,320], index: 1, kind: input, shape index: {}]   ;;  %s381_s2 = inlined_call_operand.vmem [shape: f32[1,320], index: 2, kind: input, shape index: {}]   ;;  %s382_s3 = inlined_call_operand.hbm [shape: f32[1,320], index: 3, kind: output, shape index: {}]  }
   0x1   :  { %9 = vsyncpa [#allocation4], 0  ;;  %s340_s12 = smov [#allocation2]  }
   0x2   :  { %s17_s13 = sshll.u32 %s340_s12, 4  ;;  %s18_s13 = int_to_ptr.vmem [resolvable:$true] %s17_s13 }
   0x3   :  { %s304_s14 = scalar_lea.vmem %s18_s13, 1920  ;;  %p309_p1 = scmp.lt.s32.totalorder %s18_s13, %s18_s13 }
   0x4   :  { %p305_p0 = scmp.ne.s32.totalorder %s18_s13, %s304_s14  ;;  %p310_p2 = scmp.lt.s32.totalorder %s304_s14, %s304_s14 }
   0x6   :  { %p311_p3 = por %p310_p2, %p309_p1 }
   0x8   :  { %p312_p4 = pnand %p311_p3, %p305_p0 }
   0xa   :  { %315 = shalt.err (!%p312_p4)
}
   0xb   :  { %s341_s15 = smov 384   ;;  %s342_s16 = smov 24  }
   0xc   :  { %23 = dma.hbm_to_vmem [thread:$0]  %s380_s1, 1920, %s18_s13, [#allocation3], %s341_s15, %s341_s15, %s342_s16  }
   0xd   :  { %336 = dma.done.wait [#allocation3], 1920  }
   0xe   :  { %337 = vsyncadd [#allocation3], 4294965376  ;;  %v343_v0 = vmov 0.0   ;;  %vm344_vm0 = vmmov 0   ;;  %vm67_vm1 = vcmask 1043456   ;;  %v41_v3 = vld [vmem:[#allocation2 + $0x50] sm:$0xff]  ;;  %v48_v18 = vlaneseq }
   0xf   :  { %276 = vmatprep.subr.mxu1 %v343_v0  ;;  %141 = vmatprep.mubr.f32.mxu0 %v343_v0  ;;  %v44_v1 = vld [vmem:[#allocation2 + $0x68] sm:$0xf]  ;;  %v43_v2 = vld [vmem:[#allocation2 + $0x60] sm:$0xf]  ;;  %v45_v5 = vld [vmem:[#allocation2 + $0x70] sm:$0xf] }
  0x10   :  { %286 = vmatprep.mubr.msk.f32.mxu1 %vm344_vm0, %v343_v0  ;;  %265 = vmatprep.subr.msk.mxu0 %vm67_vm1, %v44_v1  ;;  %v40_v4 = vld [vmem:[#allocation2 + $0x48] sm:$0xff]  ;;  %v38_v6 = vld [vmem:[#allocation2 + $0x38] sm:$0xff]  ;;  %v37_v8 = vld [vmem:[#allocation2 + $0x30] sm:$0xff]  ;;  %vm63_vm2 = vcmask 293888   ;;  %v49_v19 = vshrl.u32 %v48_v18, 7  ;;  %s346_s21 = smov [#allocation5]  }
  0x11   :  { %266 = vmatpush1.msk.msra.mxu0 %vm67_vm1, %v43_v2  ;;  %277 = vmatpush3.msk.msra.mxu1 %vm67_vm1, %v45_v5  ;;  %v42_v7 = vld [vmem:[#allocation2 + $0x58] sm:$0xff]  ;;  %v39_v9 = vld [vmem:[#allocation2 + $0x40] sm:$0xff]  ;;  %v36_v13 = vld [vmem:[#allocation2 + $0x28] sm:$0xff]  ;;  %v345_v20 = vmov 1966171168   ;;  %s256_s22 = sshll.u32 %s346_s21, 4  ;;  %s257_s22 = int_to_ptr.vmem [resolvable:$true] %s256_s22 }
  0x12   :  { %101 = vmatprep.subr.mxu0 %v41_v3  ;;  %278 = vmatprep.subr.mxu1 %v343_v0  ;;  %v35_v10 = vld [vmem:[#allocation2 + $0x20] sm:$0xff]  ;;  %v34_v12 = vld [vmem:[#allocation2 + $0x18] sm:$0xff]  ;;  %v32_v14 = vld [vmem:[#allocation2 + $0x8] sm:$0xff]  ;;  %v223_v21 = vunpack.c.l.s4 %v345_v20  ;;  %v58_v22 = vsub.s32 2, %v49_v19  ;;  %v50_v23 = vsub.s32 0, %v49_v19  ;;  %v54_v24 = vsub.s32 1, %v49_v19  ;;  %p321_p6 = scmp.lt.s32.totalorder %s257_s22, %s257_s22 }
  0x13   :  { %102 = vmatpush1.msra.mxu0 %v40_v4  ;;  %279 = vmatpush3.msra.mxu1 %v42_v7  ;;  %v29_v11 = vld [vmem:[%s379_s0] sm:$0x1]  ;;  %v33_v17 = vld [vmem:[#allocation2 + $0x10] sm:$0xff]  ;;  %vm247_vm3 = vcmp.lt.s32.totalorder %v48_v18, 320  ;;  %s320_s23 = scalar_lea.vmem %s257_s22, 64 }
  0x14   :  { %103 = vmatprep.subr.mxu0 %v38_v6  ;;  %280 = vmatprep.subr.mxu1 %v343_v0  ;;  %v31_v15 = vld [vmem:[#allocation2] sm:$0xff]  ;;  %v30_v16 = vmax.f32 %v29_v11, 0.0  ;;  %v224_v26 = vunpack.c.0.s8 %v223_v21 }
  0x15   :  { %104 = vmatpush1.msra.mxu0 %v37_v8  ;;  %281 = vmatpush3.msra.mxu1 %v39_v9  ;;  %v46_v25 = vld [vmem:[%s381_s2] sm:$0x7]  ;;  %s316_s2 = scalar_lea.vmem %s257_s22, 48 }
  0x16   :  { %105 = vmatprep.subr.mxu0 %v35_v10  ;;  %282 = vmatprep.subr.mxu1 %v343_v0  ;;  %v59_v27 = vrot.slane %v46_v25, %v58_v22  ;;  %v51_v28 = vrot.slane %v46_v25, %v50_v23  ;;  %v55_v29 = vrot.slane %v46_v25, %v54_v24  ;;  %p317_p5 = scmp.ne.s32.totalorder %s257_s22, %s316_s2  ;;  %p322_p7 = scmp.lt.s32.totalorder %s320_s23, %s316_s2 }
  0x17   :  { %106 = vmatpush1.msra.mxu0 %v34_v12  ;;  %283 = vmatpush3.msra.mxu1 %v36_v13  ;;  %v227_v32 = vsub.s32 %v224_v26, %v49_v19 }
  0x18   :  { %107 = vmatprep.subr.mxu0 %v32_v14  ;;  %284 = vmatprep.subr.mxu1 %v343_v0  ;;  %p323_p8 = por %p322_p7, %p321_p6 }
  0x19   :  { %108 = vmatpush1.msra.mxu0 %v31_v15  ;;  %285 = vmatpush3.msra.mxu1 %v33_v17 }
  0x1a   :  { %267 = vmatmul.mubr.msk.f32.vlgmr.msra.gmra.mxu0 %vm63_vm2, %v30_v16  ;;  %287 = vmatmul.mubr.msk.f32.vlgmr.msra.gmra.mxu1 %vm63_vm2, %v30_v16  ;;  %p324_p9 = pnand %p323_p8, %p317_p5 }
  0xda   :  { %v143_v30 = vpop.f32.mrf.mxu0  ;;  %v214_v31 = vpop.f32.mrf.mxu1 }
  0xdb   :  { %v215_v33 = vadd.f32 %v214_v31, %v59_v27  ;;  %v144_v36 = vadd.f32 %v143_v30, %v51_v28 }
  0xdc   :  { %v145_v34 = vpop.f32.mrf.mxu0  ;;  %v288_v35 = vpop.f32.mrf.mxu1 }
  0xdd   :  { %v146_v37 = vadd.f32 %v145_v34, %v55_v29  ;;  %v235_v39 = vrot.slane %v215_v33, %v227_v32 }
  0xdf   :  { %v221_v38 = vcombine.low %v144_v36, %v146_v37 }
  0xe1   :  { %v228_v40 = vrot.slane %v221_v38, %v227_v32 }
  0xe3   :  { %v236_v41 = vcombine.low %v228_v40, %v235_v39 }
  0xe5   :  { %v243_v42 = vrot.slane %v236_v41, %v227_v32 }
  0xe7   :  { %249 = vst.msk [vmem:[#allocation5] sm:$0x7] %vm247_vm3, %v243_v42 }
  0xe8   :  { %327 = shalt.err (!%p324_p9)
}
  0xe9   :  { %259 = dma.vmem_to_hbm [thread:$0]  %s257_s22, 48, %s382_s3, [#allocation4]  }
  0xea   :  { %338 = dma.done.wait [#allocation4], 48  }
  0xeb   :  { %339 = vsyncadd [#allocation4], 4294967248 }
  0xec   :  { %263 = vsyncpa [#allocation3], 1 }
  0xed   :  { %264 = vsyncpa [#allocation4], 1 }

</bundles_post_ra>
